<compile_context>
chip_gen: v5e
topology: v5e:2x2
jax: 0.10.0
libtpu: 0.0.40
codegen_flags: <defaults>
</compile_context>

<pallas_src>
import jax
import jax.numpy as jnp
from jax.experimental import pallas as pl
from jax.experimental.pallas import tpu as pltpu


def _round_up(a, m):
    return ((a + m - 1) // m) * m


def _head_kernel(x_ref, w1_ref, b1_ref, w2_ref, b2_ref, o_ref):
    # fc1: (TB, D) @ (D, H) -> (TB, H), bf16 inputs, f32 MXU accumulation.
    h = jnp.dot(x_ref[...], w1_ref[...], preferred_element_type=jnp.float32)
    # bias + ReLU + bf16 down-cast fused in one expression feeding the 2nd dot.
    # BatchNorm(eval) + Dropout(p=0) are folded into w2/b2 in the wrapper.
    h = jnp.maximum(h + b1_ref[...], 0.0).astype(w2_ref.dtype)
    # fc_out: (TB, H) @ (H, C_pad) -> (TB, C_pad), f32 accumulation.
    logits = jnp.dot(h, w2_ref[...], preferred_element_type=jnp.float32)
    o_ref[...] = (logits + b2_ref[...]).astype(o_ref.dtype)


def classification_head(x, w1, b1, gamma, beta, running_mean, running_var,
                        w2, b2, eps=1e-5, *,
                        batch_tile=1024,        # sweep 512-2048; biggest that fits
                        two_step_min=512,       # >=2 grid steps (v7x dual-TC) once halves >=256 rows
                        lane=128,
                        out_dtype=jnp.float32,  # set jnp.bfloat16 on mem-bound v6e if consumer allows
                        return_padded=False,    # True: skip (B_pad,128)->(B,C) slice pass
                        pallas_min_batch=256):  # below this: plain-XLA fallback
    """x: (B, input_dim) f32. Returns logits (B, num_classes) in out_dtype."""
    B, D = x.shape
    H = w1.shape[1]
    C = w2.shape[1]

    # ---- small-batch fallback: avoid launch/cast/pad/slice fixed costs -----
    if B < pallas_min_batch:
        h = jnp.maximum(x @ w1 + b1, 0.0)
        h = (h - running_mean) / jnp.sqrt(running_var + eps) * gamma + beta
        return (h @ w2 + b2).astype(out_dtype)

    # ---- plain-JAX parameter prep (folds & layout plumbing) ----------------
    # Fold eval-mode BatchNorm into fc_out (valid because ReLU precedes BN):
    scale = gamma / jnp.sqrt(running_var + eps)            # (H,)
    shift = beta - running_mean * scale                    # (H,)
    w2_f = scale[:, None] * w2                             # (H, C), f32 fold
    b2_f = b2 + shift @ w2                                 # (C,)

    # Lane-dense class axis: zero-pad C up to exactly one 128-lane multiple.
    C_pad = _round_up(C, lane)
    w2_p = jnp.zeros((H, C_pad), jnp.bfloat16).at[:, :C].set(w2_f.astype(jnp.bfloat16))
    b2_p = jnp.zeros((1, C_pad), jnp.float32).at[:, :C].set(b2_f.astype(jnp.float32))

    w1_b = w1.astype(jnp.bfloat16)
    b1_2d = b1.reshape(1, H).astype(jnp.float32)

    # ---- batch tiling: >=2 parallel steps when big enough, minimal padding --
    B8 = _round_up(B, 8)
    n_steps = max(1, -(-B8 // batch_tile))
    if B8 >= two_step_min:
        n_steps = max(n_steps, 2)          # keep both v7x TensorCores busy
    TB = _round_up(-(-B8 // n_steps), 8)
    B_pad = n_steps * TB
    grid = (n_steps,)

    # Fused bf16 cast + zero-pad of x: one HBM pass (no separate cast then pad).
    if B_pad == B:
        x_b = x.astype(jnp.bfloat16)
    else:
        x_b = jnp.zeros((B_pad, D), jnp.bfloat16).at[:B].set(x.astype(jnp.bfloat16))

    out_bytes = jnp.dtype(out_dtype).itemsize

    # Explicit VMEM budget (double-buffered x/out + resident weights + f32 h),
    # so bigger tiles compile on v5e's 16 MiB scoped default.
    footprint = (2 * TB * D * 2
                 + 2 * TB * C_pad * out_bytes
                 + 2 * (D * H * 2 + H * 4 + H * C_pad * 2 + C_pad * 4)
                 + TB * H * 4)
    vmem_limit = int(min(64 << 20, max(16 << 20, 2 * footprint)))

    # Advisory cost hint for XLA's scheduler.
    flops = 2 * B_pad * D * H + 2 * B_pad * H * C_pad
    bytes_accessed = (B_pad * D * 2 + D * H * 2 + H * 4
                      + H * C_pad * 2 + C_pad * 4 + B_pad * C_pad * out_bytes)
    cost = pl.CostEstimate(flops=flops, transcendentals=0,
                           bytes_accessed=bytes_accessed)

    out = pl.pallas_call(
        _head_kernel,
        out_shape=jax.ShapeDtypeStruct((B_pad, C_pad), out_dtype),
        grid=grid,
        in_specs=[
            pl.BlockSpec((TB, D), lambda i: (i, 0)),       # x tile per grid step
            pl.BlockSpec((D, H), lambda i: (0, 0)),        # w1 (resident)
            pl.BlockSpec((1, H), lambda i: (0, 0)),        # b1
            pl.BlockSpec((H, C_pad), lambda i: (0, 0)),    # w2 (BN-folded, padded)
            pl.BlockSpec((1, C_pad), lambda i: (0, 0)),    # b2 (BN-folded, padded)
        ],
        out_specs=pl.BlockSpec((TB, C_pad), lambda i: (i, 0)),
        compiler_params=pltpu.CompilerParams(
            dimension_semantics=("parallel",),
            vmem_limit_bytes=vmem_limit),
        cost_estimate=cost,
    )(x_b, w1_b, b1_2d, w2_p, b2_p)

    if return_padded:
        return out              # (B_pad, C_pad) — let the consumer fuse the slice
    return out[:B, :C]


def init_params(key, input_dim=256, hidden=512, num_classes=10):
    """Deterministic synthetic init mimicking the PyTorch module's shapes."""
    k1, k2, k3, k4, k5, k6, k7 = jax.random.split(key, 7)
    # fc1: PyTorch default bound = 1/sqrt(fan_in)
    bound1 = 1.0 / jnp.sqrt(input_dim)
    w1 = jax.random.uniform(k1, (input_dim, hidden), jnp.float32, -bound1, bound1)
    b1 = jax.random.uniform(k2, (hidden,), jnp.float32, -bound1, bound1)
    # BatchNorm1d(512): affine params + nontrivial running stats (eval mode)
    gamma = 1.0 + 0.1 * jax.random.normal(k3, (hidden,), jnp.float32)
    beta = 0.1 * jax.random.normal(k4, (hidden,), jnp.float32)
    running_mean = 0.05 * jax.random.normal(k5, (hidden,), jnp.float32)
    running_var = jnp.abs(1.0 + 0.1 * jax.random.normal(k6, (hidden,), jnp.float32))
    # fc_out: xavier_uniform with gain 0.1 (num_classes != 2 branch), bias = 0
    gain = 0.1
    bound2 = gain * jnp.sqrt(6.0 / (hidden + num_classes))
    w2 = jax.random.uniform(k7, (hidden, num_classes), jnp.float32, -bound2, bound2)
    b2 = jnp.zeros((num_classes,), jnp.float32)
    return w1, b1, gamma, beta, running_mean, running_var, w2, b2


def reference(x, w1, b1, gamma, beta, running_mean, running_var, w2, b2, eps=1e-5):
    h = jnp.maximum(x @ w1 + b1, 0.0)
    h = (h - running_mean) / jnp.sqrt(running_var + eps) * gamma + beta
    return h @ w2 + b2


if __name__ == "__main__":
    D, H, C = 256, 512, 10
    key = jax.random.PRNGKey(0)
    kx1, kx2, kp = jax.random.split(key, 3)
    params = init_params(kp, input_dim=D, hidden=H, num_classes=C)

    # Small batch (single grid step) — force the Pallas path past the fallback.
    x_small = jax.random.normal(kx1, (8, D), jnp.float32)
    out_small = jax.block_until_ready(
        classification_head(x_small, *params, pallas_min_batch=0))
    ref_small = reference(x_small, *params)
    assert out_small.shape == (8, C)
    assert jnp.allclose(out_small, ref_small, atol=1e-2, rtol=1e-2), "mismatch (B=8)"

    # Ragged mid-size batch: exercises fused cast+pad and the >=2-step grid.
    x_big = jax.random.normal(kx2, (530, D), jnp.float32)
    out_big = jax.block_until_ready(
        classification_head(x_big, *params, pallas_min_batch=0))
    ref_big = reference(x_big, *params)
    assert out_big.shape == (530, C)
    assert jnp.allclose(out_big, ref_big, atol=1e-2, rtol=1e-2), "mismatch (B=530)"

    print("KERNEL_OK")
</pallas_src>

<mosaic_0001>
module attributes {stable_mosaic.version = 11 : i64} {
  func.func @_head_kernel(%arg0: i32, %arg1: memref<8x256xbf16, #tpu.memory_space<vmem>>, %arg2: memref<256x512xbf16, #tpu.memory_space<vmem>>, %arg3: memref<1x512xf32, #tpu.memory_space<vmem>>, %arg4: memref<512x128xbf16, #tpu.memory_space<vmem>>, %arg5: memref<1x128xf32, #tpu.memory_space<vmem>>, %arg6: memref<8x128xf32, #tpu.memory_space<vmem>>) attributes {dimension_semantics = [#tpu.dimension_semantics<parallel>], iteration_bounds = array<i64: 1>, scalar_prefetch = 0 : i64, scratch_operands = 0 : i64, tpu.core_type = #tpu.core_type<tc>, window_params = [{transform_indices = @transform_0, window_bounds = array<i64: 8, 256>}, {pipeline_mode = #tpu.pipeline_mode<synchronous>, transform_indices = @transform_1, window_bounds = array<i64: 256, 512>}, {pipeline_mode = #tpu.pipeline_mode<synchronous>, transform_indices = @transform_2, window_bounds = array<i64: 1, 512>}, {pipeline_mode = #tpu.pipeline_mode<synchronous>, transform_indices = @transform_3, window_bounds = array<i64: 512, 128>}, {pipeline_mode = #tpu.pipeline_mode<synchronous>, transform_indices = @transform_4, window_bounds = array<i64: 1, 128>}, {transform_indices = @transform_5, window_bounds = array<i64: 8, 128>}]} {
    %c0 = arith.constant 0 : index
    %c0_0 = arith.constant 0 : index
    %0 = vector.load %arg1[%c0, %c0_0] : memref<8x256xbf16, #tpu.memory_space<vmem>>, vector<8x256xbf16>
    %c0_1 = arith.constant 0 : index
    %c0_2 = arith.constant 0 : index
    %1 = vector.load %arg2[%c0_1, %c0_2] : memref<256x512xbf16, #tpu.memory_space<vmem>>, vector<256x512xbf16>
    %cst = arith.constant dense<0.000000e+00> : vector<8x512xf32>
    %2 = tpu.matmul %0, %1, %cst {dimension_numbers = #tpu.dot_dimension_numbers<[1], [0], [0], [1], [0, 0, 1, 1], [], []>} : vector<8x256xbf16>, vector<256x512xbf16>, vector<8x512xf32> -> vector<8x512xf32>
    %c0_3 = arith.constant 0 : index
    %c0_4 = arith.constant 0 : index
    %3 = vector.load %arg3[%c0_3, %c0_4] : memref<1x512xf32, #tpu.memory_space<vmem>>, vector<1x512xf32>
    %4 = vector.broadcast %3 : vector<1x512xf32> to vector<8x512xf32>
    %5 = arith.addf %2, %4 : vector<8x512xf32>
    %cst_5 = arith.constant 0.000000e+00 : f32
    %6 = vector.broadcast %cst_5 : f32 to vector<8x512xf32>
    %7 = arith.maximumf %5, %6 : vector<8x512xf32>
    %8 = arith.truncf %7 : vector<8x512xf32> to vector<8x512xbf16>
    %c0_6 = arith.constant 0 : index
    %c0_7 = arith.constant 0 : index
    %9 = vector.load %arg4[%c0_6, %c0_7] : memref<512x128xbf16, #tpu.memory_space<vmem>>, vector<512x128xbf16>
    %cst_8 = arith.constant dense<0.000000e+00> : vector<8x128xf32>
    %10 = tpu.matmul %8, %9, %cst_8 {dimension_numbers = #tpu.dot_dimension_numbers<[1], [0], [0], [1], [0, 0, 1, 1], [], []>} : vector<8x512xbf16>, vector<512x128xbf16>, vector<8x128xf32> -> vector<8x128xf32>
    %c0_9 = arith.constant 0 : index
    %c0_10 = arith.constant 0 : index
    %11 = vector.load %arg5[%c0_9, %c0_10] : memref<1x128xf32, #tpu.memory_space<vmem>>, vector<1x128xf32>
    %12 = vector.broadcast %11 : vector<1x128xf32> to vector<8x128xf32>
    %13 = arith.addf %10, %12 : vector<8x128xf32>
    %c0_11 = arith.constant 0 : index
    %c0_12 = arith.constant 0 : index
    %14 = vector.load %arg6[%c0_11, %c0_12] : memref<8x128xf32, #tpu.memory_space<vmem>>, vector<8x128xf32>
    tpu.vector_store %arg6[%c0_11, %c0_12], %13 {strides = array<i32>} : memref<8x128xf32, #tpu.memory_space<vmem>>, vector<8x128xf32>,
    return
  }
  func.func @transform_0(%arg0: i32) -> (i32, i32) {
    %c0_i32 = arith.constant 0 : i32
    %c0_i32_0 = arith.constant 0 : i32
    return %arg0, %c0_i32 : i32, i32
  }
  func.func @transform_1(%arg0: i32) -> (i32, i32) {
    %c0_i32 = arith.constant 0 : i32
    %c0_i32_0 = arith.constant 0 : i32
    %c0_i32_1 = arith.constant 0 : i32
    return %c0_i32, %c0_i32_0 : i32, i32
  }
  func.func @transform_2(%arg0: i32) -> (i32, i32) {
    %c0_i32 = arith.constant 0 : i32
    %c0_i32_0 = arith.constant 0 : i32
    %c0_i32_1 = arith.constant 0 : i32
    return %c0_i32, %c0_i32_0 : i32, i32
  }
  func.func @transform_3(%arg0: i32) -> (i32, i32) {
    %c0_i32 = arith.constant 0 : i32
    %c0_i32_0 = arith.constant 0 : i32
    %c0_i32_1 = arith.constant 0 : i32
    return %c0_i32, %c0_i32_0 : i32, i32
  }
  func.func @transform_4(%arg0: i32) -> (i32, i32) {
    %c0_i32 = arith.constant 0 : i32
    %c0_i32_0 = arith.constant 0 : i32
    %c0_i32_1 = arith.constant 0 : i32
    return %c0_i32, %c0_i32_0 : i32, i32
  }
  func.func @transform_5(%arg0: i32) -> (i32, i32) {
    %c0_i32 = arith.constant 0 : i32
    %c0_i32_0 = arith.constant 0 : i32
    return %arg0, %c0_i32 : i32, i32
  }
}

</mosaic_0001>

<bundles_post_ra>
// kernel: tpu_custom_call.1
= control target key start
LH: loop header
LB: loop body
LE: loop exit
PB: predicated region body
PF: predicated region fallthrough
CT: control target
= control target key end

     0   :  { %10 = vsyncpa [#allocation3], 0  ;;  %s1613_s0 = inlined_call_operand.hbm [shape: bf16[8,256], index: 0, kind: input, shape index: {}]   ;;  %s1614_s1 = inlined_call_operand.hbm [shape: bf16[256,512], index: 1, kind: input, shape index: {}]   ;;  %s1615_s2 = inlined_call_operand.hbm [shape: f32[1,512], index: 2, kind: input, shape index: {}]   ;;  %s1616_s3 = inlined_call_operand.hbm [shape: bf16[512,128], index: 3, kind: input, shape index: {}]   ;;  %s1617_s4 = inlined_call_operand.vmem [shape: f32[1,128], index: 4, kind: input, shape index: {}]   ;;  %s1618_s5 = inlined_call_operand.hbm [shape: f32[8,128], index: 5, kind: output, shape index: {}]  }
   0x1   :  { %11 = vsyncpa [#allocation6], 0 }
   0x2   :  { %12 = vsyncpa [#allocation9], 0  ;;  %s29_s20 = sshll.u32 %s1614_s1, 4  ;;  %s30_s20 = int_to_ptr.hbm [resolvable:$true] %s29_s20 }
   0x3   :  { %13 = vsyncpa [#allocation4], 0  ;;  %s1544_s21 = smov [#allocation5]   ;;  %s19_s25 = sshll.u32 %s1613_s0, 4  ;;  %s20_s25 = int_to_ptr.hbm [resolvable:$true] %s19_s25 }
   0x4   :  { %s31_s22 = sshll.u32 %s1544_s21, 4  ;;  %s1545_s26 = smov 256   ;;  %s32_s22 = int_to_ptr.vmem [resolvable:$true] %s31_s22 }
   0x5   :  { %s1546_s27 = smov 16   ;;  %s1547_s28 = smov [#allocation2]  }
   0x6   :  { %37 = dma.hbm_to_vmem [thread:$0]  %s30_s20, 8192, %s32_s22, [#allocation6], %s1545_s26, %s1545_s26, %s1546_s27  }
   0x7   :  { %s21_s29 = sshll.u32 %s1547_s28, 4  ;;  %s43_s7 = sshll.u32 %s1615_s2, 4  ;;  %s22_s29 = int_to_ptr.vmem [resolvable:$true] %s21_s29  ;;  %s44_s7 = int_to_ptr.hbm [resolvable:$true] %s43_s7 }
   0x8   :  { %24 = dma.hbm_to_vmem [thread:$0]  %s20_s25, 128, %s22_s29, [#allocation3]  }
   0x9   :  { %s53_s9 = sshll.u32 %s1616_s3, 4  ;;  %s1548_s10 = smov [#allocation7]   ;;  %s54_s9 = int_to_ptr.hbm [resolvable:$true] %s53_s9 }
   0xa   :  { %s45_s11 = sshll.u32 %s1548_s10, 4  ;;  %s1549_s0 = smov [#allocation8]   ;;  %s46_s11 = int_to_ptr.vmem [resolvable:$true] %s45_s11 }
   0xb   :  { %48 = dma.hbm_to_vmem [thread:$0]  %s44_s7, 64, %s46_s11, [#allocation6]  }
   0xc   :  { %s55_s12 = sshll.u32 %s1549_s0, 4  ;;  %s1550_s13 = smov 64   ;;  %s56_s12 = int_to_ptr.vmem [resolvable:$true] %s55_s12 }
   0xd   :  { %s1551_s14 = smov 4  }
   0xe   :  { %61 = dma.hbm_to_vmem [thread:$0]  %s54_s9, 4096, %s56_s12, [#allocation9], %s1550_s13, %s1550_s13, %s1551_s14  }
   0xf   :  { %1536 = dma.done.wait [#allocation3], 128  }
  0x10   :  { %1537 = vsyncadd [#allocation3], 4294967168 }
  0x11   :  { %1538 = dma.done.wait [#allocation6], 8256  }
  0x12   :  { %1539 = vsyncadd [#allocation6], 4294959040 }
  0x13   :  { %1540 = dma.done.wait [#allocation9], 4096  }
  0x14   :  { %1541 = vsyncadd [#allocation9], 4294963200  ;;  %v1040_v0 = vld [vmem:[#allocation5 + $0xe0] sm:$0xf]  ;;  %v1340_v1 = vld [vmem:[#allocation5 + $0xec] sm:$0xf0] }
  0x15   :  { %v1168_v2 = vld [vmem:[#allocation5 + $0x1e0] sm:$0xf]  ;;  %v1041_v3 = vor.u32 %v1340_v1, %v1040_v0  ;;  %v1372_v4 = vld [vmem:[#allocation5 + $0x1ec] sm:$0xf0]  ;;  %v1338_v5 = vld [vmem:[#allocation5 + $0xe4] sm:$0xf] }
  0x16   :  { %v1042_v6 = vld [vmem:[#allocation5 + $0xf0] sm:$0xf0]  ;;  %v1169_v7 = vor.u32 %v1372_v4, %v1168_v2  ;;  %v1370_v9 = vld [vmem:[#allocation5 + $0x1e4] sm:$0xf]  ;;  %v1024_v11 = vld [vmem:[#allocation5 + $0xc0] sm:$0xf] }
  0x17   :  { %v1045_v8 = vor.u32 %v1338_v5, %v1042_v6  ;;  %v1170_v10 = vld [vmem:[#allocation5 + $0x1f0] sm:$0xf0]  ;;  %482 = vmatpush.bf16.msra.mxu0 %v1041_v3  ;;  %v1336_v13 = vld [vmem:[#allocation5 + $0xcc] sm:$0xf0]  ;;  %v1152_v14 = vld [vmem:[#allocation5 + $0x1c0] sm:$0xf] }
  0x18   :  { %v1173_v12 = vor.u32 %v1370_v9, %v1170_v10  ;;  %v1368_v15 = vld [vmem:[#allocation5 + $0x1cc] sm:$0xf0]  ;;  %495 = vmatpush.bf16.msra.mxu1 %v1169_v7  ;;  %v1025_v16 = vor.u32 %v1336_v13, %v1024_v11  ;;  %v1334_v18 = vld [vmem:[#allocation5 + $0xc4] sm:$0xf]  ;;  %v1026_v19 = vld [vmem:[#allocation5 + $0xd0] sm:$0xf0] }
  0x19   :  { %508 = vmatpush.bf16.msra.mxu2 %v1045_v8  ;;  %v1153_v17 = vor.u32 %v1368_v15, %v1152_v14  ;;  %v1366_v20 = vld [vmem:[#allocation5 + $0x1c4] sm:$0xf]  ;;  %v1029_v21 = vor.u32 %v1334_v18, %v1026_v19  ;;  %v1154_v22 = vld [vmem:[#allocation5 + $0x1d0] sm:$0xf0]  ;;  %v1008_v23 = vld [vmem:[#allocation5 + $0xa0] sm:$0xf] }
  0x1a   :  { %521 = vmatpush.bf16.msra.mxu3 %v1173_v12  ;;  %v1332_v24 = vld [vmem:[#allocation5 + $0xac] sm:$0xf0]  ;;  %v1157_v25 = vor.u32 %v1366_v20, %v1154_v22  ;;  %v1136_v26 = vld [vmem:[#allocation5 + $0x1a0] sm:$0xf]  ;;  %v1330_v28 = vld [vmem:[#allocation5 + $0xa4] sm:$0xf] }
  0x1b   :  { %v1364_v27 = vld [vmem:[#allocation5 + $0x1ac] sm:$0xf0]  ;;  %483 = vmatpush.bf16.msra.mxu0 %v1025_v16  ;;  %v1009_v29 = vor.u32 %v1332_v24, %v1008_v23  ;;  %v1010_v30 = vld [vmem:[#allocation5 + $0xb0] sm:$0xf0]  ;;  %v1362_v31 = vld [vmem:[#allocation5 + $0x1a4] sm:$0xf] }
  0x1c   :  { %v1138_v32 = vld [vmem:[#allocation5 + $0x1b0] sm:$0xf0]  ;;  %496 = vmatpush.bf16.msra.mxu1 %v1153_v17  ;;  %v1137_v33 = vor.u32 %v1364_v27, %v1136_v26  ;;  %v1013_v34 = vor.u32 %v1330_v28, %v1010_v30  ;;  %v992_v35 = vld [vmem:[#allocation5 + $0x80] sm:$0xf]  ;;  %v1328_v36 = vld [vmem:[#allocation5 + $0x8c] sm:$0xf0] }
  0x1d   :  { %509 = vmatpush.bf16.msra.mxu2 %v1029_v21  ;;  %v1120_v37 = vld [vmem:[#allocation5 + $0x180] sm:$0xf]  ;;  %v1141_v38 = vor.u32 %v1362_v31, %v1138_v32  ;;  %v1360_v39 = vld [vmem:[#allocation5 + $0x18c] sm:$0xf0]  ;;  %v1326_v40 = vld [vmem:[#allocation5 + $0x84] sm:$0xf]  ;;  %v993_v44 = vor.u32 %v1328_v36, %v992_v35 }
  0x1e   :  { %522 = vmatpush.bf16.msra.mxu3 %v1157_v25  ;;  %v994_v41 = vld [vmem:[#allocation5 + $0x90] sm:$0xf0]  ;;  %v1358_v42 = vld [vmem:[#allocation5 + $0x184] sm:$0xf]  ;;  %v1121_v45 = vor.u32 %v1360_v39, %v1120_v37  ;;  %v976_v47 = vld [vmem:[#allocation5 + $0x60] sm:$0xf] }
  0x1f   :  { %v1122_v43 = vld [vmem:[#allocation5 + $0x190] sm:$0xf0]  ;;  %484 = vmatpush.bf16.msra.mxu0 %v1009_v29  ;;  %v997_v46 = vor.u32 %v1326_v40, %v994_v41  ;;  %v1324_v48 = vld [vmem:[#allocation5 + $0x6c] sm:$0xf0]  ;;  %v1104_v49 = vld [vmem:[#allocation5 + $0x160] sm:$0xf] }
  0x20   :  { %497 = vmatpush.bf16.msra.mxu1 %v1137_v33  ;;  %v1125_v50 = vor.u32 %v1358_v42, %v1122_v43  ;;  %v1356_v51 = vld [vmem:[#allocation5 + $0x16c] sm:$0xf0]  ;;  %v1322_v52 = vld [vmem:[#allocation5 + $0x64] sm:$0xf]  ;;  %v978_v53 = vld [vmem:[#allocation5 + $0x70] sm:$0xf0]  ;;  %v977_v56 = vor.u32 %v1324_v48, %v976_v47 }
  0x21   :  { %510 = vmatpush.bf16.msra.mxu2 %v1013_v34  ;;  %v1354_v54 = vld [vmem:[#allocation5 + $0x164] sm:$0xf]  ;;  %v1106_v55 = vld [vmem:[#allocation5 + $0x170] sm:$0xf0]  ;;  %v1105_v57 = vor.u32 %v1356_v51, %v1104_v49  ;;  %v981_v58 = vor.u32 %v1322_v52, %v978_v53  ;;  %v960_v59 = vld [vmem:[#allocation5 + $0x40] sm:$0xf] }
  0x22   :  { %523 = vmatpush.bf16.msra.mxu3 %v1141_v38  ;;  %v1320_v60 = vld [vmem:[#allocation5 + $0x4c] sm:$0xf0]  ;;  %v1088_v61 = vld [vmem:[#allocation5 + $0x140] sm:$0xf]  ;;  %v1109_v62 = vor.u32 %v1354_v54, %v1106_v55  ;;  %v1318_v0 = vld [vmem:[#allocation5 + $0x44] sm:$0xf] }
  0x23   :  { %485 = vmatpush.bf16.msra.mxu0 %v993_v44  ;;  %v1352_v63 = vld [vmem:[#allocation5 + $0x14c] sm:$0xf0]  ;;  %v962_v1 = vld [vmem:[#allocation5 + $0x50] sm:$0xf0]  ;;  %v1350_v2 = vld [vmem:[#allocation5 + $0x144] sm:$0xf]  ;;  %v961_v4 = vor.u32 %v1320_v60, %v960_v59 }
  0x24   :  { %498 = vmatpush.bf16.msra.mxu1 %v1121_v45  ;;  %v1090_v3 = vld [vmem:[#allocation5 + $0x150] sm:$0xf0]  ;;  %v1089_v5 = vor.u32 %v1352_v63, %v1088_v61  ;;  %v965_v6 = vor.u32 %v1318_v0, %v962_v1  ;;  %v944_v7 = vld [vmem:[#allocation5 + $0x20] sm:$0xf]  ;;  %v1316_v8 = vld [vmem:[#allocation5 + $0x2c] sm:$0xf0] }
  0x25   :  { %511 = vmatpush.bf16.msra.mxu2 %v997_v46  ;;  %v1072_v9 = vld [vmem:[#allocation5 + $0x120] sm:$0xf]  ;;  %v1093_v10 = vor.u32 %v1350_v2, %v1090_v3  ;;  %v1348_v11 = vld [vmem:[#allocation5 + $0x12c] sm:$0xf0]  ;;  %v1314_v12 = vld [vmem:[#allocation5 + $0x24] sm:$0xf]  ;;  %v945_v16 = vor.u32 %v1316_v8, %v944_v7 }
  0x26   :  { %524 = vmatpush.bf16.msra.mxu3 %v1125_v50  ;;  %v946_v13 = vld [vmem:[#allocation5 + $0x30] sm:$0xf0]  ;;  %v1346_v14 = vld [vmem:[#allocation5 + $0x124] sm:$0xf]  ;;  %v928_v17 = vld [vmem:[#allocation5] sm:$0xf]  ;;  %v1073_v20 = vor.u32 %v1348_v11, %v1072_v9 }
  0x27   :  { %486 = vmatpush.bf16.msra.mxu0 %v977_v56  ;;  %v1074_v15 = vld [vmem:[#allocation5 + $0x130] sm:$0xf0]  ;;  %v1312_v18 = vld [vmem:[#allocation5 + $0xc] sm:$0xf0]  ;;  %v1056_v19 = vld [vmem:[#allocation5 + $0x100] sm:$0xf]  ;;  %v949_v21 = vor.u32 %v1314_v12, %v946_v13 }
  0x28   :  { %499 = vmatpush.bf16.msra.mxu1 %v1105_v57  ;;  %v1344_v22 = vld [vmem:[#allocation5 + $0x10c] sm:$0xf0]  ;;  %v1310_v23 = vld [vmem:[#allocation5 + $0x4] sm:$0xf]  ;;  %v930_v24 = vld [vmem:[#allocation5 + $0x10] sm:$0xf0]  ;;  %v1077_v25 = vor.u32 %v1346_v14, %v1074_v15  ;;  %v929_v32 = vor.u32 %v1312_v18, %v928_v17 }
  0x29   :  { %512 = vmatpush.bf16.msra.mxu2 %v981_v58  ;;  %v1342_v26 = vld [vmem:[#allocation5 + $0x104] sm:$0xf]  ;;  %v1058_v27 = vld [vmem:[#allocation5 + $0x110] sm:$0xf0]  ;;  %v1048_v28 = vld [vmem:[#allocation5 + $0xe8] sm:$0xf]  ;;  %v1057_v37 = vor.u32 %v1344_v22, %v1056_v19  ;;  %v933_v38 = vor.u32 %v1310_v23, %v930_v24 }
  0x2a   :  { %525 = vmatpush.bf16.msra.mxu3 %v1109_v62  ;;  %v1341_v29 = vld [vmem:[#allocation5 + $0xf4] sm:$0xf0]  ;;  %v1176_v30 = vld [vmem:[#allocation5 + $0x1e8] sm:$0xf]  ;;  %v1339_v34 = vld [vmem:[#allocation5 + $0xec] sm:$0xf]  ;;  %v1061_v42 = vor.u32 %v1342_v26, %v1058_v27 }
  0x2b   :  { %487 = vmatpush.bf16.msra.mxu0 %v961_v4  ;;  %v80_v31 = vld [vmem:[#allocation2] sm:$0xff]  ;;  %v1371_v39 = vld [vmem:[#allocation5 + $0x1ec] sm:$0xf]  ;;  %v1049_v43 = vor.u32 %v1341_v29, %v1048_v28  ;;  %v1032_v46 = vld [vmem:[#allocation5 + $0xc8] sm:$0xf]  ;;  %s1552_s15 = smov [#allocation10]  }
  0x2c   :  { %500 = vmatpush.bf16.msra.mxu1 %v1089_v5  ;;  %v1373_v33 = vld [vmem:[#allocation5 + $0x1f4] sm:$0xf0]  ;;  %v1050_v35 = vld [vmem:[#allocation5 + $0xf8] sm:$0xf0]  ;;  %v156_v36 = vunpack.c.l.b16 %v80_v31  ;;  %v157_v41 = vunpack.c.h.b16 %v80_v31  ;;  %v1160_v48 = vld [vmem:[#allocation5 + $0x1c8] sm:$0xf] }
  0x2d   :  { %513 = vmatpush.bf16.msra.mxu2 %v965_v6  ;;  %v1178_v40 = vld [vmem:[#allocation5 + $0x1f8] sm:$0xf0]  ;;  %v1177_v44 = vor.u32 %v1373_v33, %v1176_v30  ;;  %v1053_v45 = vor.u32 %v1339_v34, %v1050_v35  ;;  %v1337_v47 = vld [vmem:[#allocation5 + $0xd4] sm:$0xf0]  ;;  %v1335_v51 = vld [vmem:[#allocation5 + $0xcc] sm:$0xf] }
  0x2e   :  { %526 = vmatpush.bf16.msra.mxu3 %v1093_v10  ;;  %v1181_v49 = vor.u32 %v1371_v39, %v1178_v40  ;;  %v1369_v50 = vld [vmem:[#allocation5 + $0x1d4] sm:$0xf0]  ;;  %v1034_v52 = vld [vmem:[#allocation5 + $0xd8] sm:$0xf0]  ;;  %v1595_v53 = vpack.c.b16 %v156_v36, %v156_v36  ;;  %v1367_v54 = vld [vmem:[#allocation5 + $0x1cc] sm:$0xf]  ;;  %v1597_v56 = vpack.c.b16 %v157_v41, %v157_v41  ;;  %v1033_v57 = vor.u32 %v1337_v47, %v1032_v46 }
  0x2f   :  { %488 = vmatpush.bf16.msra.mxu0 %v945_v16  ;;  %v1162_v55 = vld [vmem:[#allocation5 + $0x1d8] sm:$0xf0]  ;;  %v1161_v58 = vor.u32 %v1369_v50, %v1160_v48  ;;  %v1037_v59 = vor.u32 %v1335_v51, %v1034_v52  ;;  %v1016_v60 = vld [vmem:[#allocation5 + $0xa8] sm:$0xf]  ;;  %v1333_v61 = vld [vmem:[#allocation5 + $0xb4] sm:$0xf0] }
  0x30   :  { %501 = vmatpush.bf16.msra.mxu1 %v1073_v20  ;;  %v1144_v62 = vld [vmem:[#allocation5 + $0x1a8] sm:$0xf]  ;;  %v1165_v63 = vor.u32 %v1367_v54, %v1162_v55  ;;  %v1365_v0 = vld [vmem:[#allocation5 + $0x1b4] sm:$0xf0]  ;;  %v1331_v1 = vld [vmem:[#allocation5 + $0xac] sm:$0xf]  ;;  %v1017_v5 = vor.u32 %v1333_v61, %v1016_v60 }
  0x31   :  { %514 = vmatpush.bf16.msra.mxu2 %v949_v21  ;;  %v1018_v2 = vld [vmem:[#allocation5 + $0xb8] sm:$0xf0]  ;;  %v1363_v3 = vld [vmem:[#allocation5 + $0x1ac] sm:$0xf]  ;;  %v1145_v6 = vor.u32 %v1365_v0, %v1144_v62  ;;  %v1000_v8 = vld [vmem:[#allocation5 + $0x88] sm:$0xf] }
  0x32   :  { %527 = vmatpush.bf16.msra.mxu3 %v1077_v25  ;;  %v1146_v4 = vld [vmem:[#allocation5 + $0x1b8] sm:$0xf0]  ;;  %v1021_v7 = vor.u32 %v1331_v1, %v1018_v2  ;;  %v1329_v9 = vld [vmem:[#allocation5 + $0x94] sm:$0xf0]  ;;  %v1128_v10 = vld [vmem:[#allocation5 + $0x188] sm:$0xf] }
  0x33   :  { %489 = vmatpush.bf16.msra.mxu0 %v929_v32  ;;  %v1149_v11 = vor.u32 %v1363_v3, %v1146_v4  ;;  %v1361_v12 = vld [vmem:[#allocation5 + $0x194] sm:$0xf0]  ;;  %v1327_v13 = vld [vmem:[#allocation5 + $0x8c] sm:$0xf]  ;;  %v1002_v14 = vld [vmem:[#allocation5 + $0x98] sm:$0xf0]  ;;  %v1001_v17 = vor.u32 %v1329_v9, %v1000_v8 }
  0x34   :  { %502 = vmatpush.bf16.msra.mxu1 %v1057_v37  ;;  %v1359_v15 = vld [vmem:[#allocation5 + $0x18c] sm:$0xf]  ;;  %v1130_v16 = vld [vmem:[#allocation5 + $0x198] sm:$0xf0]  ;;  %v1129_v18 = vor.u32 %v1361_v12, %v1128_v10  ;;  %v1005_v19 = vor.u32 %v1327_v13, %v1002_v14  ;;  %v984_v20 = vld [vmem:[#allocation5 + $0x68] sm:$0xf] }
  0x35   :  { %515 = vmatpush.bf16.msra.mxu2 %v933_v38  ;;  %v1325_v21 = vld [vmem:[#allocation5 + $0x74] sm:$0xf0]  ;;  %v1112_v22 = vld [vmem:[#allocation5 + $0x168] sm:$0xf]  ;;  %v1133_v23 = vor.u32 %v1359_v15, %v1130_v16  ;;  %v1323_v25 = vld [vmem:[#allocation5 + $0x6c] sm:$0xf] }
  0x36   :  { %528 = vmatpush.bf16.msra.mxu3 %v1061_v42  ;;  %490 = vmatmul.bf16.vlgmr.msra.gmra.mxu0 %v1595_v53  ;;  %v1357_v24 = vld [vmem:[#allocation5 + $0x174] sm:$0xf0]  ;;  %v986_v26 = vld [vmem:[#allocation5 + $0x78] sm:$0xf0]  ;;  %v1355_v27 = vld [vmem:[#allocation5 + $0x16c] sm:$0xf]  ;;  %v985_v29 = vor.u32 %v1325_v21, %v984_v20 }
  0x37   :  { %534 = vmatpush.bf16.msrb.mxu0 %v1049_v43  ;;  %503 = vmatmul.bf16.vlgmr.msra.gmra.mxu1 %v1597_v56  ;;  %v1114_v28 = vld [vmem:[#allocation5 + $0x178] sm:$0xf0]  ;;  %v968_v30 = vld [vmem:[#allocation5 + $0x48] sm:$0xf]  ;;  %v1113_v31 = vor.u32 %v1357_v24, %v1112_v22  ;;  %v989_v32 = vor.u32 %v1323_v25, %v986_v26  ;;  %v1321_v33 = vld [vmem:[#allocation5 + $0x54] sm:$0xf0] }
  0x38   :  { %547 = vmatpush.bf16.msrb.mxu1 %v1177_v44  ;;  %516 = vmatmul.bf16.vlgmr.msra.gmra.mxu2 %v1595_v53  ;;  %v1096_v34 = vld [vmem:[#allocation5 + $0x148] sm:$0xf]  ;;  %v1117_v35 = vor.u32 %v1355_v27, %v1114_v28  ;;  %v1353_v36 = vld [vmem:[#allocation5 + $0x154] sm:$0xf0]  ;;  %v1319_v37 = vld [vmem:[#allocation5 + $0x4c] sm:$0xf]  ;;  %v969_v41 = vor.u32 %v1321_v33, %v968_v30 }
  0x39   :  { %560 = vmatpush.bf16.msrb.mxu2 %v1053_v45  ;;  %529 = vmatmul.bf16.vlgmr.msra.gmra.mxu3 %v1597_v56  ;;  %v970_v38 = vld [vmem:[#allocation5 + $0x58] sm:$0xf0]  ;;  %v1351_v39 = vld [vmem:[#allocation5 + $0x14c] sm:$0xf]  ;;  %v1097_v42 = vor.u32 %v1353_v36, %v1096_v34  ;;  %v952_v44 = vld [vmem:[#allocation5 + $0x28] sm:$0xf] }
  0x3a   :  { %573 = vmatpush.bf16.msrb.mxu3 %v1181_v49  ;;  %v1098_v40 = vld [vmem:[#allocation5 + $0x158] sm:$0xf0]  ;;  %v973_v43 = vor.u32 %v1319_v37, %v970_v38  ;;  %v1317_v45 = vld [vmem:[#allocation5 + $0x34] sm:$0xf0]  ;;  %v1080_v46 = vld [vmem:[#allocation5 + $0x128] sm:$0xf] }
  0x3b   :  { %535 = vmatpush.bf16.msrb.mxu0 %v1033_v57  ;;  %v1101_v47 = vor.u32 %v1351_v39, %v1098_v40  ;;  %v1349_v48 = vld [vmem:[#allocation5 + $0x134] sm:$0xf0]  ;;  %v1315_v49 = vld [vmem:[#allocation5 + $0x2c] sm:$0xf]  ;;  %v954_v50 = vld [vmem:[#allocation5 + $0x38] sm:$0xf0]  ;;  %v953_v54 = vor.u32 %v1317_v45, %v952_v44 }
  0x3c   :  { %548 = vmatpush.bf16.msrb.mxu1 %v1161_v58  ;;  %v1347_v51 = vld [vmem:[#allocation5 + $0x12c] sm:$0xf]  ;;  %v1082_v52 = vld [vmem:[#allocation5 + $0x138] sm:$0xf0]  ;;  %v1081_v55 = vor.u32 %v1349_v48, %v1080_v46  ;;  %v957_v57 = vor.u32 %v1315_v49, %v954_v50  ;;  %v936_v58 = vld [vmem:[#allocation5 + $0x8] sm:$0xf] }
  0x3d   :  { %561 = vmatpush.bf16.msrb.mxu2 %v1037_v59  ;;  %v1313_v59 = vld [vmem:[#allocation5 + $0x14] sm:$0xf0]  ;;  %v1064_v60 = vld [vmem:[#allocation5 + $0x108] sm:$0xf]  ;;  %v1085_v61 = vor.u32 %v1347_v51, %v1082_v52  ;;  %v938_v0 = vld [vmem:[#allocation5 + $0x18] sm:$0xf0] }
  0x3e   :  { %574 = vmatpush.bf16.msrb.mxu3 %v1165_v63  ;;  %v1345_v62 = vld [vmem:[#allocation5 + $0x114] sm:$0xf0]  ;;  %v1311_v63 = vld [vmem:[#allocation5 + $0xc] sm:$0xf]  ;;  %v1066_v2 = vld [vmem:[#allocation5 + $0x118] sm:$0xf0]  ;;  %v937_v3 = vor.u32 %v1313_v59, %v936_v58 }
  0x3f   :  { %536 = vmatpush.bf16.msrb.mxu0 %v1017_v5  ;;  %v1343_v1 = vld [vmem:[#allocation5 + $0x10c] sm:$0xf]  ;;  %v1065_v4 = vor.u32 %v1345_v62, %v1064_v60  ;;  %v941_v5 = vor.u32 %v1311_v63, %v938_v0  ;;  %v1389_v8 = vld [vmem:[#allocation8 + $0x78] sm:$0xff]  ;;  %v1380_v10 = vld [vmem:[#allocation8 + $0x30] sm:$0xff]  ;;  %s912_s16 = sshll.u32 %s1552_s15, 4  ;;  %s914_s19 = sshll.u32 %s1618_s5, 4  ;;  %s913_s16 = int_to_ptr.vmem [resolvable:$true] %s912_s16  ;;  %s915_s19 = int_to_ptr.hbm [resolvable:$true] %s914_s19 }
  0x40   :  { %549 = vmatpush.bf16.msrb.mxu1 %v1145_v6  ;;  %v1069_v6 = vor.u32 %v1343_v1, %v1066_v2  ;;  %v1397_v9 = vld [vmem:[#allocation8 + $0xb8] sm:$0xff]  ;;  %v1379_v12 = vld [vmem:[#allocation8 + $0x28] sm:$0xff]  ;;  %v1378_v14 = vld [vmem:[#allocation8 + $0x20] sm:$0xff] }
  0x41   :  { %562 = vmatpush.bf16.msrb.mxu2 %v1021_v7  ;;  %v1381_v7 = vld [vmem:[#allocation8 + $0x38] sm:$0xff]  ;;  %v1387_v13 = vld [vmem:[#allocation8 + $0x68] sm:$0xff]  ;;  %v1386_v15 = vld [vmem:[#allocation8 + $0x60] sm:$0xff] }
  0x42   :  { %575 = vmatpush.bf16.msrb.mxu3 %v1149_v11  ;;  %v1388_v11 = vld [vmem:[#allocation8 + $0x70] sm:$0xff]  ;;  %v1377_v16 = vld [vmem:[#allocation8 + $0x18] sm:$0xff]  ;;  %v1383_v20 = vld [vmem:[#allocation8 + $0x48] sm:$0xff] }
  0x43   :  { %537 = vmatpush.bf16.msrb.mxu0 %v1001_v17  ;;  %v1385_v17 = vld [vmem:[#allocation8 + $0x58] sm:$0xff]  ;;  %v1395_v22 = vld [vmem:[#allocation8 + $0xa8] sm:$0xff]  ;;  %v1382_v24 = vld [vmem:[#allocation8 + $0x40] sm:$0xff] }
  0x44   :  { %550 = vmatpush.bf16.msrb.mxu1 %v1129_v18  ;;  %v1376_v18 = vld [vmem:[#allocation8 + $0x10] sm:$0xff]  ;;  %v1405_v21 = vld [vmem:[#allocation8 + $0xf8] sm:$0xff]  ;;  %v1394_v26 = vld [vmem:[#allocation8 + $0xa0] sm:$0xff] }
  0x45   :  { %563 = vmatpush.bf16.msrb.mxu2 %v1005_v19  ;;  %v1384_v19 = vld [vmem:[#allocation8 + $0x50] sm:$0xff]  ;;  %v1403_v27 = vld [vmem:[#allocation8 + $0xe8] sm:$0xff]  ;;  %v1393_v28 = vld [vmem:[#allocation8 + $0x98] sm:$0xff] }
  0x46   :  { %576 = vmatpush.bf16.msrb.mxu3 %v1133_v23  ;;  %v1374_v23 = vld [vmem:[#allocation8] sm:$0xff]  ;;  %v1404_v25 = vld [vmem:[#allocation8 + $0xf0] sm:$0xff]  ;;  %v1391_v34 = vld [vmem:[#allocation8 + $0x88] sm:$0xff] }
  0x47   :  { %538 = vmatpush.bf16.msrb.mxu0 %v985_v29  ;;  %v1402_v29 = vld [vmem:[#allocation8 + $0xe0] sm:$0xff]  ;;  %v1392_v30 = vld [vmem:[#allocation8 + $0x90] sm:$0xff] }
  0x48   :  { %551 = vmatpush.bf16.msrb.mxu1 %v1113_v31  ;;  %v145_v31 = vld [vmem:[#allocation7] sm:$0xf]  ;;  %v1400_v36 = vld [vmem:[#allocation8 + $0xd0] sm:$0xff]  ;;  %v1390_v40 = vld [vmem:[#allocation8 + $0x80] sm:$0xff] }
  0x49   :  { %564 = vmatpush.bf16.msrb.mxu2 %v989_v32  ;;  %v1401_v32 = vld [vmem:[#allocation8 + $0xd8] sm:$0xff]  ;;  %v147_v33 = vperm.slane %v145_v31, 0  ;;  %v148_v39 = vperm.slane %v145_v31, 1  ;;  %v1398_v50 = vld [vmem:[#allocation8 + $0xc0] sm:$0xff]  ;;  %v149_v58 = vperm.slane %v145_v31, 2  ;;  %v150_v63 = vperm.slane %v145_v31, 3 }
  0x4a   :  { %577 = vmatpush.bf16.msrb.mxu3 %v1117_v35 }
  0x4b   :  { %539 = vmatpush.bf16.msrb.mxu0 %v969_v41 }
  0x4c   :  { %552 = vmatpush.bf16.msrb.mxu1 %v1097_v42  ;;  %v1399_v42 = vld [vmem:[#allocation8 + $0xc8] sm:$0xff] }
  0x4d   :  { %565 = vmatpush.bf16.msrb.mxu2 %v973_v43 }
  0x4e   :  { %578 = vmatpush.bf16.msrb.mxu3 %v1101_v47 }
  0x4f   :  { %540 = vmatpush.bf16.msrb.mxu0 %v953_v54 }
  0x50   :  { %553 = vmatpush.bf16.msrb.mxu1 %v1081_v55 }
  0x51   :  { %566 = vmatpush.bf16.msrb.mxu2 %v957_v57 }
  0x52   :  { %579 = vmatpush.bf16.msrb.mxu3 %v1085_v61 }
  0x53   :  { %541 = vmatpush.bf16.msrb.mxu0 %v937_v3 }
  0x54   :  { %554 = vmatpush.bf16.msrb.mxu1 %v1065_v4 }
  0x55   :  { %567 = vmatpush.bf16.msrb.mxu2 %v941_v5 }
  0x56   :  { %580 = vmatpush.bf16.msrb.mxu3 %v1069_v6  ;;  %542 = vmatmul.bf16.vlgmr.msrb.gmra.mxu0 %v1595_v53 }
  0x57   :  { %854 = vmatpush.bf16.msra.mxu0 %v1381_v7  ;;  %555 = vmatmul.bf16.vlgmr.msrb.gmra.mxu1 %v1597_v56 }
  0x58   :  { %867 = vmatpush.bf16.msra.mxu1 %v1389_v8  ;;  %568 = vmatmul.bf16.vlgmr.msrb.gmra.mxu2 %v1595_v53  ;;  %v1396_v53 = vld [vmem:[#allocation8 + $0xb0] sm:$0xff] }
  0x59   :  { %581 = vmatmul.bf16.vlgmr.msrb.gmra.mxu3 %v1597_v56  ;;  %880 = vmatpush.bf16.msra.mxu2 %v1397_v9  ;;  %v1375_v56 = vld [vmem:[#allocation8 + $0x8] sm:$0xff] }
  0x5a   :  { %893 = vmatpush.bf16.msra.mxu3 %v1405_v21 }
  0x5b   :  { %855 = vmatpush.bf16.msra.mxu0 %v1380_v10 }
  0x5c   :  { %868 = vmatpush.bf16.msra.mxu1 %v1388_v11 }
  0x5d   :  { %881 = vmatpush.bf16.msra.mxu2 %v1396_v53 }
  0x5e   :  { %894 = vmatpush.bf16.msra.mxu3 %v1404_v25 }
  0x5f   :  { %856 = vmatpush.bf16.msra.mxu0 %v1379_v12 }
  0x60   :  { %869 = vmatpush.bf16.msra.mxu1 %v1387_v13 }
  0x61   :  { %882 = vmatpush.bf16.msra.mxu2 %v1395_v22 }
  0x62   :  { %895 = vmatpush.bf16.msra.mxu3 %v1403_v27 }
  0x63   :  { %857 = vmatpush.bf16.msra.mxu0 %v1378_v14 }
  0x64   :  { %870 = vmatpush.bf16.msra.mxu1 %v1386_v15 }
  0x65   :  { %883 = vmatpush.bf16.msra.mxu2 %v1394_v26 }
  0x66   :  { %896 = vmatpush.bf16.msra.mxu3 %v1402_v29 }
  0x67   :  { %858 = vmatpush.bf16.msra.mxu0 %v1377_v16  ;;  %v1415_v16 = vld [vmem:[%s1617_s4] ss:$0 sm:$0xff] }
  0x68   :  { %871 = vmatpush.bf16.msra.mxu1 %v1385_v17 }
  0x69   :  { %884 = vmatpush.bf16.msra.mxu2 %v1393_v28 }
  0x6a   :  { %897 = vmatpush.bf16.msra.mxu3 %v1401_v32 }
  0x6b   :  { %859 = vmatpush.bf16.msra.mxu0 %v1376_v18 }
  0x6c   :  { %872 = vmatpush.bf16.msra.mxu1 %v1384_v19 }
  0x6d   :  { %885 = vmatpush.bf16.msra.mxu2 %v1392_v30 }
  0x6e   :  { %898 = vmatpush.bf16.msra.mxu3 %v1400_v36 }
  0x6f   :  { %860 = vmatpush.bf16.msra.mxu0 %v1375_v56 }
  0x70   :  { %873 = vmatpush.bf16.msra.mxu1 %v1383_v20 }
  0x71   :  { %886 = vmatpush.bf16.msra.mxu2 %v1391_v34 }
  0x72   :  { %899 = vmatpush.bf16.msra.mxu3 %v1399_v42 }
  0x73   :  { %861 = vmatpush.bf16.msra.mxu0 %v1374_v23 }
  0x74   :  { %874 = vmatpush.bf16.msra.mxu1 %v1382_v24 }
  0x75   :  { %887 = vmatpush.bf16.msra.mxu2 %v1390_v40 }
  0x76   :  { %900 = vmatpush.bf16.msra.mxu3 %v1398_v50 }
  0xb3   :  { %v491_v35 = vpop.f32.mrf.mxu0 }
  0xb4   :  { %v492_v37 = vadd.f32 %v491_v35, %v147_v33  ;;  %v504_v38 = vpop.f32.mrf.mxu1 }
  0xb6   :  { %v505_v41 = vadd.f32 %v504_v38, %v492_v37 }
  0xb8   :  { %v586_v44 = vmax.f32 %v505_v41, 0.0 }
  0xba   :  { %v590_v47 = vpack.c.bf16 %v586_v44, %v586_v44 }
  0xbb   :  { %v517_v43 = vpop.f32.mrf.mxu2  ;;  %v493_v49 = vpop.f32.mrf.mxu0 }
  0xbc   :  { %v518_v45 = vadd.f32 %v517_v43, %v148_v39  ;;  %v530_v46 = vpop.f32.mrf.mxu3  ;;  %862 = vmatmul.bf16.vlgmr.msra.gmra.mxu0 %v590_v47  ;;  %v506_v51 = vpop.f32.mrf.mxu1 }
  0xbe   :  { %v531_v48 = vadd.f32 %v530_v46, %v518_v45 }
  0xc0   :  { %v587_v52 = vmax.f32 %v531_v48, 0.0 }
  0xc2   :  { %v591_v54 = vpack.c.bf16 %v587_v52, %v587_v52 }
  0xc3   :  { %v519_v55 = vpop.f32.mrf.mxu2 }
  0xc4   :  { %875 = vmatmul.bf16.vlgmr.msra.gmra.mxu1 %v591_v54  ;;  %v532_v57 = vpop.f32.mrf.mxu3 }
  0xd3   :  { %v543_v59 = vpop.f32.mrf.mxu0 }
  0xd4   :  { %v544_v60 = vadd.f32 %v543_v59, %v149_v58  ;;  %v556_v61 = vpop.f32.mrf.mxu1 }
  0xd6   :  { %v557_v62 = vadd.f32 %v556_v61, %v544_v60 }
  0xd8   :  { %v588_v0 = vmax.f32 %v557_v62, 0.0 }
  0xda   :  { %v592_v1 = vpack.c.bf16 %v588_v0, %v588_v0 }
  0xdb   :  { %v569_v2 = vpop.f32.mrf.mxu2  ;;  %v545_v5 = vpop.f32.mrf.mxu0 }
  0xdc   :  { %v570_v3 = vadd.f32 %v569_v2, %v150_v63  ;;  %v582_v4 = vpop.f32.mrf.mxu3  ;;  %v558_v6 = vpop.f32.mrf.mxu1  ;;  %888 = vmatmul.bf16.vlgmr.msra.gmra.mxu2 %v592_v1 }
  0xde   :  { %v583_v7 = vadd.f32 %v582_v4, %v570_v3 }
  0xe0   :  { %v589_v8 = vmax.f32 %v583_v7, 0.0 }
  0xe2   :  { %v593_v9 = vpack.c.bf16 %v589_v8, %v589_v8 }
  0xe3   :  { %v571_v10 = vpop.f32.mrf.mxu2 }
  0xe4   :  { %v584_v11 = vpop.f32.mrf.mxu3  ;;  %901 = vmatmul.bf16.vlgmr.msra.gmra.mxu3 %v593_v9 }
 0x139   :  { %v863_v12 = vpop.f32.mrf.mxu0 }
 0x13a   :  { %v864_v17 = vadd.f32 %v1415_v16, %v863_v12 }
 0x141   :  { %v876_v13 = vpop.f32.mrf.mxu1  ;;  %v865_v14 = vpop.f32.mrf.mxu0 }
 0x142   :  { %v877_v19 = vadd.f32 %v876_v13, %v864_v17 }
 0x149   :  { %v878_v15 = vpop.f32.mrf.mxu1 }
 0x15f   :  { %v889_v18 = vpop.f32.mrf.mxu2 }
 0x160   :  { %v890_v53 = vadd.f32 %v889_v18, %v877_v19 }
 0x167   :  { %v902_v56 = vpop.f32.mrf.mxu3  ;;  %v891_v21 = vpop.f32.mrf.mxu2 }
 0x168   :  { %v903_v20 = vadd.f32 %v902_v56, %v890_v53 }
 0x16a   :  { %906 = vst [vmem:[#allocation10] sm:$0xff] %v903_v20 }
 0x16b   :  { %917 = dma.vmem_to_hbm [thread:$0]  %s913_s16, 128, %s915_s19, [#allocation4]  }
 0x16f   :  { %v904_v22 = vpop.f32.mrf.mxu3 }
 0x170   :  { %1542 = dma.done.wait [#allocation4], 128  }
 0x171   :  { %1543 = vsyncadd [#allocation4], 4294967168 }
 0x172   :  { %922 = vsyncpa [#allocation3], 1 }
 0x173   :  { %923 = vsyncpa [#allocation6], 1 }
 0x174   :  { %924 = vsyncpa [#allocation9], 1 }
 0x175   :  { %925 = vsyncpa [#allocation4], 1 }

</bundles_post_ra>
